<compile_context>
chip_gen: v6e
topology: v6e:2x2x1
jax: 0.10.0
libtpu: 0.0.40
codegen_flags: <defaults>
</compile_context>

<pallas_src>
import jax
import jax.numpy as jnp
from jax.experimental import pallas as pl
from jax.experimental.pallas import tpu as pltpu


def _fcn_upsample_kernel(x_ref, wblk_ref, b_ref, kt_ref, o_ref):
    # x_ref   : (N*Cin,  H*W)        bf16   flattened NCHW input
    # wblk_ref: (N*Cout, N*Cin)      bf16   block-diagonal 1x1-conv weight
    # b_ref   : (N*Cout, 1)          f32    bias (tiled over batch)
    # kt_ref  : (H*W,    Hout*Wout)  bf16   kron(Uh, Uw).T interpolation matrix
    # o_ref   : (N*Cout, Hout*Wout)  f32

    # 1x1 convolution (channel mixing) — bf16 MXU matmul, f32 accumulate.
    y = jnp.dot(wblk_ref[...], x_ref[...],
                preferred_element_type=jnp.float32)          # (N*Cout, H*W) f32
    y = y + b_ref[...]                                        # f32 bias add (VPU)

    # Fused separable align_corners=True bilinear upsample: one big matmul.
    o_ref[...] = jnp.dot(y.astype(kt_ref.dtype), kt_ref[...],
                         preferred_element_type=jnp.float32)  # (N*Cout, Hout*Wout)


def _align_corners_matrix(n_in: int, n_out: int) -> jnp.ndarray:
    """Dense (n_out, n_in) linear-interpolation matrix, align_corners=True."""
    if n_in == 1:
        return jnp.ones((n_out, 1), dtype=jnp.float32)
    src = jnp.arange(n_out, dtype=jnp.float32) * (n_in - 1) / (n_out - 1)
    lo = jnp.clip(jnp.floor(src).astype(jnp.int32), 0, n_in - 2)
    frac = src - lo.astype(jnp.float32)
    u = jnp.zeros((n_out, n_in), dtype=jnp.float32)
    rows = jnp.arange(n_out)
    u = u.at[rows, lo].add(1.0 - frac)
    u = u.at[rows, lo + 1].add(frac)
    return u


def fcn_upsampling(x, conv_weight, conv_bias, scale_factor: int = 2):
    """x: (N, Cin, H, W); conv_weight: (Cout, Cin, 1, 1); conv_bias: (Cout,)."""
    n, cin, h, w = x.shape
    cout = conv_weight.shape[0]
    sf = 2 ** (scale_factor - 1)
    hout, wout = h * sf, w * sf
    hw, howo = h * w, hout * wout

    # ---- wrapper-side layout plumbing (all lane-dense, no in-kernel reshapes) ----
    # Fold the batch into the channel-mix matmul with a block-diagonal weight:
    # row n*Cout+o of Wblk applies Wc[o, :] to rows n*Cin .. n*Cin+Cin-1 of Xflat.
    wc = conv_weight.reshape(cout, cin).astype(jnp.float32)
    wblk = jnp.kron(jnp.eye(n, dtype=jnp.float32), wc).astype(jnp.bfloat16)  # (N*Cout, N*Cin)
    bblk = jnp.tile(conv_bias.astype(jnp.float32).reshape(cout, 1), (n, 1))  # (N*Cout, 1)
    x_flat = x.astype(jnp.float32).reshape(n * cin, hw).astype(jnp.bfloat16)  # (N*Cin, H*W)

    # Fused 2-D interpolation matrix: out[.., p*Wout+q] = sum_{h,w} Uh[p,h]*Uw[q,w]*y[.., h*W+w]
    uh = _align_corners_matrix(h, hout)                  # (Hout, H)
    uw = _align_corners_matrix(w, wout)                  # (Wout, W)
    kt = jnp.kron(uh, uw).T.astype(jnp.bfloat16)         # (H*W, Hout*Wout)

    out_flat = pl.pallas_call(
        _fcn_upsample_kernel,
        out_shape=jax.ShapeDtypeStruct((n * cout, howo), jnp.float32),
        grid_spec=pltpu.PrefetchScalarGridSpec(
            num_scalar_prefetch=0,
            grid=(1,),
            in_specs=[
                pl.BlockSpec((n * cin, hw), lambda i: (0, 0)),
                pl.BlockSpec((n * cout, n * cin), lambda i: (0, 0)),
                pl.BlockSpec((n * cout, 1), lambda i: (0, 0)),
                pl.BlockSpec((hw, howo), lambda i: (0, 0)),
            ],
            out_specs=pl.BlockSpec((n * cout, howo), lambda i: (0, 0)),
        ),
        compiler_params=pltpu.CompilerParams(
            dimension_semantics=("arbitrary",),
        ),
    )(x_flat, wblk, bblk, kt)

    # (N*Cout, Hout*Wout) -> (N, Cout, Hout, Wout)  (pure metadata reshape)
    return out_flat.reshape(n, cout, hout, wout)


def _reference(x, conv_weight, conv_bias, scale_factor: int = 2):
    """Pure-JAX f32 reference: 1x1 conv + align_corners=True bilinear upsample."""
    n, cin, h, w = x.shape
    cout = conv_weight.shape[0]
    sf = 2 ** (scale_factor - 1)
    wc = conv_weight.reshape(cout, cin)
    y = jnp.einsum("oi,nihw->nohw", wc, x) + conv_bias[None, :, None, None]
    uh = _align_corners_matrix(h, h * sf)
    uw = _align_corners_matrix(w, w * sf)
    return jnp.einsum("ph,qw,nchw->ncpq", uh, uw, y)


if __name__ == "__main__":
    key = jax.random.PRNGKey(0)
    k_x, k_w, k_b = jax.random.split(key, 3)

    N, Cin, Cout, H, W = 2, 4, 4, 16, 16
    x = jax.random.normal(k_x, (N, Cin, H, W), dtype=jnp.float32)
    # Deterministic synthetic parameters (shapes match nn.Conv2d(Cin, Cout, 1)).
    conv_weight = jax.random.normal(k_w, (Cout, Cin, 1, 1), dtype=jnp.float32) * 0.1
    conv_bias = jax.random.normal(k_b, (Cout,), dtype=jnp.float32) * 0.1

    out = fcn_upsampling(x, conv_weight, conv_bias)
    out = jax.block_until_ready(out)

    ref = _reference(x, conv_weight, conv_bias)
    assert out.shape == (N, Cout, 2 * H, 2 * W), out.shape
    # bf16 MXU operands with f32 accumulation -> relaxed tolerance vs f32 ref.
    assert jnp.allclose(out, ref, atol=5e-2, rtol=5e-2), float(
        jnp.max(jnp.abs(out - ref))
    )
    print("KERNEL_OK")
</pallas_src>

<mosaic_0001>
module attributes {stable_mosaic.version = 11 : i64} {
  func.func @_fcn_upsample_kernel(%arg0: i32, %arg1: memref<8x256xbf16, #tpu.memory_space<vmem>>, %arg2: memref<8x8xbf16, #tpu.memory_space<vmem>>, %arg3: memref<8x1xf32, #tpu.memory_space<vmem>>, %arg4: memref<256x1024xbf16, #tpu.memory_space<vmem>>, %arg5: memref<8x1024xf32, #tpu.memory_space<vmem>>) attributes {dimension_semantics = [#tpu.dimension_semantics<arbitrary>], iteration_bounds = array<i64: 1>, scalar_prefetch = 0 : i64, scratch_operands = 0 : i64, tpu.core_type = #tpu.core_type<tc>, window_params = [{pipeline_mode = #tpu.pipeline_mode<synchronous>, transform_indices = @transform_0, window_bounds = array<i64: 8, 256>}, {pipeline_mode = #tpu.pipeline_mode<synchronous>, transform_indices = @transform_1, window_bounds = array<i64: 8, 8>}, {pipeline_mode = #tpu.pipeline_mode<synchronous>, transform_indices = @transform_2, window_bounds = array<i64: 8, 1>}, {pipeline_mode = #tpu.pipeline_mode<synchronous>, transform_indices = @transform_3, window_bounds = array<i64: 256, 1024>}, {pipeline_mode = #tpu.pipeline_mode<synchronous>, transform_indices = @transform_4, window_bounds = array<i64: 8, 1024>}]} {
    %c0 = arith.constant 0 : index
    %c0_0 = arith.constant 0 : index
    %0 = vector.load %arg2[%c0, %c0_0] : memref<8x8xbf16, #tpu.memory_space<vmem>>, vector<8x8xbf16>
    %c0_1 = arith.constant 0 : index
    %c0_2 = arith.constant 0 : index
    %1 = vector.load %arg1[%c0_1, %c0_2] : memref<8x256xbf16, #tpu.memory_space<vmem>>, vector<8x256xbf16>
    %cst = arith.constant dense<0.000000e+00> : vector<8x256xf32>
    %2 = tpu.matmul %0, %1, %cst {dimension_numbers = #tpu.dot_dimension_numbers<[1], [0], [0], [1], [0, 0, 1, 1], [], []>} : vector<8x8xbf16>, vector<8x256xbf16>, vector<8x256xf32> -> vector<8x256xf32>
    %c0_3 = arith.constant 0 : index
    %c0_4 = arith.constant 0 : index
    %3 = vector.load %arg3[%c0_3, %c0_4] : memref<8x1xf32, #tpu.memory_space<vmem>>, vector<8x1xf32>
    %4 = vector.broadcast %3 : vector<8x1xf32> to vector<8x256xf32>
    %5 = arith.addf %2, %4 : vector<8x256xf32>
    %6 = arith.truncf %5 : vector<8x256xf32> to vector<8x256xbf16>
    %c0_5 = arith.constant 0 : index
    %c0_6 = arith.constant 0 : index
    %7 = vector.load %arg4[%c0_5, %c0_6] : memref<256x1024xbf16, #tpu.memory_space<vmem>>, vector<256x1024xbf16>
    %cst_7 = arith.constant dense<0.000000e+00> : vector<8x1024xf32>
    %8 = tpu.matmul %6, %7, %cst_7 {dimension_numbers = #tpu.dot_dimension_numbers<[1], [0], [0], [1], [0, 0, 1, 1], [], []>} : vector<8x256xbf16>, vector<256x1024xbf16>, vector<8x1024xf32> -> vector<8x1024xf32>
    %c0_8 = arith.constant 0 : index
    %c0_9 = arith.constant 0 : index
    %9 = vector.load %arg5[%c0_8, %c0_9] : memref<8x1024xf32, #tpu.memory_space<vmem>>, vector<8x1024xf32>
    tpu.vector_store %arg5[%c0_8, %c0_9], %8 {strides = array<i32>} : memref<8x1024xf32, #tpu.memory_space<vmem>>, vector<8x1024xf32>,
    return
  }
  func.func @transform_0(%arg0: i32) -> (i32, i32) {
    %c0_i32 = arith.constant 0 : i32
    %c0_i32_0 = arith.constant 0 : i32
    %c0_i32_1 = arith.constant 0 : i32
    return %c0_i32, %c0_i32_0 : i32, i32
  }
  func.func @transform_1(%arg0: i32) -> (i32, i32) {
    %c0_i32 = arith.constant 0 : i32
    %c0_i32_0 = arith.constant 0 : i32
    %c0_i32_1 = arith.constant 0 : i32
    return %c0_i32, %c0_i32_0 : i32, i32
  }
  func.func @transform_2(%arg0: i32) -> (i32, i32) {
    %c0_i32 = arith.constant 0 : i32
    %c0_i32_0 = arith.constant 0 : i32
    %c0_i32_1 = arith.constant 0 : i32
    return %c0_i32, %c0_i32_0 : i32, i32
  }
  func.func @transform_3(%arg0: i32) -> (i32, i32) {
    %c0_i32 = arith.constant 0 : i32
    %c0_i32_0 = arith.constant 0 : i32
    %c0_i32_1 = arith.constant 0 : i32
    return %c0_i32, %c0_i32_0 : i32, i32
  }
  func.func @transform_4(%arg0: i32) -> (i32, i32) {
    %c0_i32 = arith.constant 0 : i32
    %c0_i32_0 = arith.constant 0 : i32
    %c0_i32_1 = arith.constant 0 : i32
    return %c0_i32, %c0_i32_0 : i32, i32
  }
}

</mosaic_0001>

<bundles_post_ra>
// kernel: tpu_custom_call.1
= control target key start
LH: loop header
LB: loop body
LE: loop exit
PB: predicated region body
PF: predicated region fallthrough
CT: control target
= control target key end

     0   :  { %9 = vsyncpa [#allocation3], 0  ;;  %s1327_s0 = inlined_call_operand.vmem [shape: bf16[8,256], index: 0, kind: input, shape index: {}]   ;;  %s1328_s1 = inlined_call_operand.hbm [shape: bf16[8,8], index: 1, kind: input, shape index: {}]   ;;  %s1329_s2 = inlined_call_operand.vmem [shape: f32[8,1], index: 2, kind: input, shape index: {}]   ;;  %s1330_s3 = inlined_call_operand.hbm [shape: bf16[256,1024], index: 3, kind: input, shape index: {}]   ;;  %s1331_s4 = inlined_call_operand.hbm [shape: f32[8,1024], index: 4, kind: output, shape index: {}]  }
   0x1   :  { %10 = vsyncpa [#allocation6], 0 }
   0x2   :  { %11 = vsyncpa [#allocation4], 0  ;;  %s1275_s15 = smov [#allocation2]   ;;  %s1276_s17 = smov [#allocation5]  }
   0x3   :  { %s20_s16 = sshll.u32 %s1275_s15, 4  ;;  %s31_s18 = sshll.u32 %s1276_s17, 4  ;;  %s21_s16 = int_to_ptr.vmem [resolvable:$true] %s20_s16  ;;  %s32_s18 = int_to_ptr.vmem [resolvable:$true] %s31_s18 }
   0x4   :  { %s1217_s19 = scalar_lea.vmem %s21_s16, 64  ;;  %p1222_p1 = scmp.lt.s32.totalorder %s21_s16, %s21_s16 }
   0x5   :  { %p1218_p0 = scmp.ne.s32.totalorder %s21_s16, %s1217_s19  ;;  %p1223_p2 = scmp.lt.s32.totalorder %s1217_s19, %s1217_s19 }
   0x7   :  { %p1224_p3 = por %p1223_p2, %p1222_p1 }
   0x9   :  { %p1225_p4 = pnand %p1224_p3, %p1218_p0 }
   0xb   :  { %1228 = shalt.err (!%p1225_p4)
}
   0xc   :  { %23 = dma.hbm_to_vmem [thread:$0]  %s1328_s1, 64, %s21_s16, [#allocation3]  }
   0xd   :  { %s1237_s22 = scalar_lea.vmem %s32_s18, 16384  ;;  %p1242_p6 = scmp.lt.s32.totalorder %s32_s18, %s32_s18 }
   0xe   :  { %p1238_p5 = scmp.ne.s32.totalorder %s32_s18, %s1237_s22  ;;  %p1243_p7 = scmp.lt.s32.totalorder %s1237_s22, %s1237_s22 }
  0x10   :  { %p1244_p8 = por %p1243_p7, %p1242_p6 }
  0x12   :  { %p1245_p9 = pnand %p1244_p8, %p1238_p5 }
  0x14   :  { %1248 = shalt.err (!%p1245_p9)
}
  0x15   :  { %s1277_s23 = smov 512   ;;  %s1278_s24 = smov 32  }
  0x16   :  { %37 = dma.hbm_to_vmem [thread:$0]  %s1330_s3, 16384, %s32_s18, [#allocation6], %s1277_s23, %s1277_s23, %s1278_s24  }
  0x17   :  { %1269 = dma.done.wait [#allocation3], 64  }
  0x18   :  { %1270 = vsyncadd [#allocation3], 4294967232 }
  0x19   :  { %1271 = dma.done.wait [#allocation6], 16384  }
  0x1a   :  { %1272 = vsyncadd [#allocation6], 4294950912  ;;  %v1279_v0 = vmov 0   ;;  %v46_v1 = vld [vmem:[%s1327_s0] sm:$0xff]  ;;  %vm62_vm0 = vcmask 1043456   ;;  %v169_v7 = vld [vmem:[#allocation5 + $0x1c8] sm:$0xff] }
  0x1b   :  { %101 = vmatprep.mubr.bf16.mxu0 %v1279_v0  ;;  %1206 = vset.pattern.permute.xlu0 %v1279_v0  ;;  %v47_v2 = vld [vmem:[%s1329_s2] sm:$0xff]  ;;  %v1069_v3 = vcombine.high %v46_v1, %v46_v1  ;;  %v1068_v4 = vcombine.low %v46_v1, %v46_v1  ;;  %v173_v9 = vld [vmem:[#allocation5 + $0x1e8] sm:$0xff]  ;;  %vm58_vm1 = vcmask 64512   ;;  %s1280_s0 = smov [#allocation7]  }
  0x1c   :  { %50 = vperm.xlu0 %1206, %v47_v2   ;;  %v168_v5 = vld [vmem:[#allocation5 + $0x1c0] sm:$0xff]  ;;  %v1131_v14 = vcombine.high %v169_v7, %v173_v9  ;;  %v161_v16 = vld [vmem:[#allocation5 + $0x188] sm:$0xff]  ;;  %v45_v19 = vld [vmem:[#allocation2] sm:$0xf]  ;;  %v1130_v20 = vcombine.low %v169_v7, %v173_v9  ;;  %s1058_s2 = sshll.u32 %s1280_s0, 4  ;;  %s1059_s2 = int_to_ptr.vmem [resolvable:$true] %s1058_s2 }
  0x1d   :  { %v172_v6 = vld [vmem:[#allocation5 + $0x1e0] sm:$0xff]  ;;  %1070 = vmatprep.subr.msk.bf16.mxu0 %vm62_vm0, %v1069_v3  ;;  %v64_v13 = vsel %vm62_vm0, %v1068_v4, 0  ;;  %v165_v17 = vld [vmem:[#allocation5 + $0x1a8] sm:$0xff]  ;;  %s1249_s3 = scalar_lea.vmem %s1059_s2, 1024  ;;  %p1254_p11 = scmp.lt.s32.totalorder %s1059_s2, %s1059_s2 }
  0x1e   :  { %v1129_v8 = vcombine.high %v168_v5, %v172_v6  ;;  %v1128_v10 = vcombine.low %v168_v5, %v172_v6  ;;  %v160_v11 = vld [vmem:[#allocation5 + $0x180] sm:$0xff]  ;;  %84 = vmatpush1.bf16.msra.mxu0 %v64_v13  ;;  %v1123_v22 = vcombine.high %v161_v16, %v165_v17  ;;  %v153_v25 = vld [vmem:[#allocation5 + $0x148] sm:$0xff]  ;;  %v1122_v29 = vcombine.low %v161_v16, %v165_v17  ;;  %p1250_p10 = scmp.ne.s32.totalorder %s1059_s2, %s1249_s3  ;;  %p1255_p12 = scmp.lt.s32.totalorder %s1249_s3, %s1249_s3 }
  0x1f   :  { %v164_v12 = vld [vmem:[#allocation5 + $0x1a0] sm:$0xff]  ;;  %921 = vmatprep.subr.bf16.mxu0 %v1131_v14  ;;  %v157_v26 = vld [vmem:[#allocation5 + $0x168] sm:$0xff] }
  0x20   :  { %v1121_v15 = vcombine.high %v160_v11, %v164_v12  ;;  %v152_v18 = vld [vmem:[#allocation5 + $0x140] sm:$0xff]  ;;  %880 = vmatprep.subr.bf16.mxu1 %v1129_v8  ;;  %v1120_v23 = vcombine.low %v160_v11, %v164_v12  ;;  %v1115_v30 = vcombine.high %v153_v25, %v157_v26  ;;  %v145_v33 = vld [vmem:[#allocation5 + $0x108] sm:$0xff]  ;;  %v1114_v37 = vcombine.low %v153_v25, %v157_v26  ;;  %p1256_p13 = por %p1255_p12, %p1254_p11 }
  0x21   :  { %v156_v21 = vld [vmem:[#allocation5 + $0x160] sm:$0xff]  ;;  %881 = vmatpush1.bf16.msra.mxu1 %v1128_v10  ;;  %1071 = vmatmul.mubr.msk.bf16.vlgmr.msra.gmra.mxu0 %vm58_vm1, %v45_v19  ;;  %v149_v34 = vld [vmem:[#allocation5 + $0x128] sm:$0xff] }
  0x22   :  { %882 = vmatprep.subr.bf16.mxu1 %v1121_v15  ;;  %v1113_v24 = vcombine.high %v152_v18, %v156_v21  ;;  %v144_v27 = vld [vmem:[#allocation5 + $0x100] sm:$0xff]  ;;  %922 = vmatpush1.bf16.msra.mxu0 %v1130_v20  ;;  %v1112_v31 = vcombine.low %v152_v18, %v156_v21  ;;  %v1107_v38 = vcombine.high %v145_v33, %v149_v34  ;;  %v137_v41 = vld [vmem:[#allocation5 + $0xc8] sm:$0xff]  ;;  %p1257_p0 = pnand %p1256_p13, %p1250_p10 }
  0x23   :  { %v148_v28 = vld [vmem:[#allocation5 + $0x120] sm:$0xff]  ;;  %923 = vmatprep.subr.bf16.mxu0 %v1123_v22  ;;  %v141_v42 = vld [vmem:[#allocation5 + $0xe8] sm:$0xff]  ;;  %v1106_v45 = vcombine.low %v145_v33, %v149_v34 }
  0x24   :  { %v1105_v32 = vcombine.high %v144_v27, %v148_v28  ;;  %v136_v35 = vld [vmem:[#allocation5 + $0xc0] sm:$0xff]  ;;  %v1104_v39 = vcombine.low %v144_v27, %v148_v28  ;;  %v1099_v46 = vcombine.high %v137_v41, %v141_v42  ;;  %v129_v49 = vld [vmem:[#allocation5 + $0x88] sm:$0xff]  ;;  %v1098_v53 = vcombine.low %v137_v41, %v141_v42 }
  0x25   :  { %883 = vmatpush1.bf16.msra.mxu1 %v1120_v23  ;;  %v140_v36 = vld [vmem:[#allocation5 + $0xe0] sm:$0xff]  ;;  %v133_v50 = vld [vmem:[#allocation5 + $0xa8] sm:$0xff] }
  0x26   :  { %884 = vmatprep.subr.bf16.mxu1 %v1113_v24  ;;  %924 = vmatpush1.bf16.msra.mxu0 %v1122_v29  ;;  %v1097_v40 = vcombine.high %v136_v35, %v140_v36  ;;  %v128_v43 = vld [vmem:[#allocation5 + $0x80] sm:$0xff]  ;;  %v1096_v47 = vcombine.low %v136_v35, %v140_v36  ;;  %v1091_v54 = vcombine.high %v129_v49, %v133_v50  ;;  %v121_v57 = vld [vmem:[#allocation5 + $0x48] sm:$0xff] }
  0x27   :  { %925 = vmatprep.subr.bf16.mxu0 %v1115_v30  ;;  %v132_v44 = vld [vmem:[#allocation5 + $0xa0] sm:$0xff]  ;;  %v125_v58 = vld [vmem:[#allocation5 + $0x68] sm:$0xff]  ;;  %v1090_v61 = vcombine.low %v129_v49, %v133_v50 }
  0x28   :  { %v1089_v48 = vcombine.high %v128_v43, %v132_v44  ;;  %v120_v51 = vld [vmem:[#allocation5 + $0x40] sm:$0xff]  ;;  %v1088_v55 = vcombine.low %v128_v43, %v132_v44  ;;  %v1083_v62 = vcombine.high %v121_v57, %v125_v58  ;;  %v113_v1 = vld [vmem:[#allocation5 + $0x8] sm:$0xff]  ;;  %v1082_v5 = vcombine.low %v121_v57, %v125_v58 }
  0x29   :  { %885 = vmatpush1.bf16.msra.mxu1 %v1112_v31  ;;  %v124_v52 = vld [vmem:[#allocation5 + $0x60] sm:$0xff]  ;;  %v117_v2 = vld [vmem:[#allocation5 + $0x28] sm:$0xff] }
  0x2a   :  { %886 = vmatprep.subr.bf16.mxu1 %v1105_v32  ;;  %926 = vmatpush1.bf16.msra.mxu0 %v1114_v37  ;;  %v1081_v56 = vcombine.high %v120_v51, %v124_v52  ;;  %v112_v59 = vld [vmem:[#allocation5] sm:$0xff]  ;;  %v1080_v63 = vcombine.low %v120_v51, %v124_v52  ;;  %v1075_v6 = vcombine.high %v113_v1, %v117_v2  ;;  %v233_v9 = vld [vmem:[#allocation5 + $0x3c8] sm:$0xff] }
  0x2b   :  { %927 = vmatprep.subr.bf16.mxu0 %v1107_v38  ;;  %v116_v60 = vld [vmem:[#allocation5 + $0x20] sm:$0xff]  ;;  %v237_v10 = vld [vmem:[#allocation5 + $0x3e8] sm:$0xff]  ;;  %v1074_v13 = vcombine.low %v113_v1, %v117_v2 }
  0x2c   :  { %v1073_v0 = vcombine.high %v112_v59, %v116_v60  ;;  %v232_v3 = vld [vmem:[#allocation5 + $0x3c0] sm:$0xff]  ;;  %v1072_v7 = vcombine.low %v112_v59, %v116_v60  ;;  %v1195_v14 = vcombine.high %v233_v9, %v237_v10  ;;  %v225_v17 = vld [vmem:[#allocation5 + $0x388] sm:$0xff]  ;;  %v1194_v21 = vcombine.low %v233_v9, %v237_v10  ;;  %v171_v9 = vld [vmem:[#allocation5 + $0x1d8] sm:$0xff] }
  0x2d   :  { %887 = vmatpush1.bf16.msra.mxu1 %v1104_v39  ;;  %v236_v4 = vld [vmem:[#allocation5 + $0x3e0] sm:$0xff]  ;;  %v229_v18 = vld [vmem:[#allocation5 + $0x3a8] sm:$0xff] }
  0x2e   :  { %888 = vmatprep.subr.bf16.mxu1 %v1097_v40  ;;  %928 = vmatpush1.bf16.msra.mxu0 %v1106_v45  ;;  %v1193_v8 = vcombine.high %v232_v3, %v236_v4  ;;  %v224_v11 = vld [vmem:[#allocation5 + $0x380] sm:$0xff]  ;;  %v1192_v15 = vcombine.low %v232_v3, %v236_v4  ;;  %v1187_v22 = vcombine.high %v225_v17, %v229_v18  ;;  %v217_v25 = vld [vmem:[#allocation5 + $0x348] sm:$0xff] }
  0x2f   :  { %929 = vmatprep.subr.bf16.mxu0 %v1099_v46  ;;  %v228_v12 = vld [vmem:[#allocation5 + $0x3a0] sm:$0xff]  ;;  %v221_v26 = vld [vmem:[#allocation5 + $0x368] sm:$0xff]  ;;  %v1186_v29 = vcombine.low %v225_v17, %v229_v18 }
  0x30   :  { %v1185_v16 = vcombine.high %v224_v11, %v228_v12  ;;  %v216_v19 = vld [vmem:[#allocation5 + $0x340] sm:$0xff]  ;;  %v1184_v23 = vcombine.low %v224_v11, %v228_v12  ;;  %v1179_v30 = vcombine.high %v217_v25, %v221_v26  ;;  %v209_v33 = vld [vmem:[#allocation5 + $0x308] sm:$0xff]  ;;  %v1178_v37 = vcombine.low %v217_v25, %v221_v26  ;;  %v175_v11 = vld [vmem:[#allocation5 + $0x1f8] sm:$0xff] }
  0x31   :  { %889 = vmatpush1.bf16.msra.mxu1 %v1096_v47  ;;  %v220_v20 = vld [vmem:[#allocation5 + $0x360] sm:$0xff]  ;;  %v213_v34 = vld [vmem:[#allocation5 + $0x328] sm:$0xff] }
  0x32   :  { %890 = vmatprep.subr.bf16.mxu1 %v1089_v48  ;;  %930 = vmatpush1.bf16.msra.mxu0 %v1098_v53  ;;  %v1177_v24 = vcombine.high %v216_v19, %v220_v20  ;;  %v208_v27 = vld [vmem:[#allocation5 + $0x300] sm:$0xff]  ;;  %v1176_v31 = vcombine.low %v216_v19, %v220_v20  ;;  %v1171_v38 = vcombine.high %v209_v33, %v213_v34  ;;  %v201_v41 = vld [vmem:[#allocation5 + $0x2c8] sm:$0xff]  ;;  %v162_v20 = vld [vmem:[#allocation5 + $0x190] sm:$0xff] }
  0x33   :  { %931 = vmatprep.subr.bf16.mxu0 %v1091_v54  ;;  %v212_v28 = vld [vmem:[#allocation5 + $0x320] sm:$0xff]  ;;  %v205_v42 = vld [vmem:[#allocation5 + $0x2e8] sm:$0xff]  ;;  %v1170_v45 = vcombine.low %v209_v33, %v213_v34  ;;  %v159_v33 = vld [vmem:[#allocation5 + $0x178] sm:$0xff] }
  0x34   :  { %v1169_v32 = vcombine.high %v208_v27, %v212_v28  ;;  %v200_v35 = vld [vmem:[#allocation5 + $0x2c0] sm:$0xff]  ;;  %v1168_v39 = vcombine.low %v208_v27, %v212_v28  ;;  %v1163_v46 = vcombine.high %v201_v41, %v205_v42  ;;  %v193_v49 = vld [vmem:[#allocation5 + $0x288] sm:$0xff]  ;;  %v1162_v53 = vcombine.low %v201_v41, %v205_v42  ;;  %v154_v28 = vld [vmem:[#allocation5 + $0x150] sm:$0xff] }
  0x35   :  { %891 = vmatpush1.bf16.msra.mxu1 %v1088_v55  ;;  %v204_v36 = vld [vmem:[#allocation5 + $0x2e0] sm:$0xff]  ;;  %v197_v50 = vld [vmem:[#allocation5 + $0x2a8] sm:$0xff]  ;;  %v151_v41 = vld [vmem:[#allocation5 + $0x138] sm:$0xff] }
  0x36   :  { %892 = vmatprep.subr.bf16.mxu1 %v1081_v56  ;;  %932 = vmatpush1.bf16.msra.mxu0 %v1090_v61  ;;  %v1161_v40 = vcombine.high %v200_v35, %v204_v36  ;;  %v192_v43 = vld [vmem:[#allocation5 + $0x280] sm:$0xff]  ;;  %v1160_v47 = vcombine.low %v200_v35, %v204_v36  ;;  %v1155_v54 = vcombine.high %v193_v49, %v197_v50  ;;  %v185_v57 = vld [vmem:[#allocation5 + $0x248] sm:$0xff] }
  0x37   :  { %933 = vmatprep.subr.bf16.mxu0 %v1083_v62  ;;  %v196_v44 = vld [vmem:[#allocation5 + $0x2a0] sm:$0xff]  ;;  %v189_v58 = vld [vmem:[#allocation5 + $0x268] sm:$0xff]  ;;  %v1154_v59 = vcombine.low %v193_v49, %v197_v50  ;;  %v143_v49 = vld [vmem:[#allocation5 + $0xf8] sm:$0xff] }
  0x38   :  { %v1153_v48 = vcombine.high %v192_v43, %v196_v44  ;;  %v184_v51 = vld [vmem:[#allocation5 + $0x240] sm:$0xff]  ;;  %v1152_v55 = vcombine.low %v192_v43, %v196_v44  ;;  %v1147_v60 = vcombine.high %v185_v57, %v189_v58  ;;  %v1146_v62 = vcombine.low %v185_v57, %v189_v58  ;;  %v177_v1 = vld [vmem:[#allocation5 + $0x208] sm:$0xff]  ;;  %v135_v57 = vld [vmem:[#allocation5 + $0xb8] sm:$0xff] }
  0x39   :  { %893 = vmatpush1.bf16.msra.mxu1 %v1080_v63  ;;  %v188_v52 = vld [vmem:[#allocation5 + $0x260] sm:$0xff]  ;;  %v181_v3 = vld [vmem:[#allocation5 + $0x228] sm:$0xff] }
  0x3a   :  { %894 = vmatprep.subr.bf16.mxu1 %v1073_v0  ;;  %934 = vmatpush1.bf16.msra.mxu0 %v1082_v5  ;;  %v1145_v56 = vcombine.high %v184_v51, %v188_v52  ;;  %v1144_v61 = vcombine.low %v184_v51, %v188_v52  ;;  %v176_v63 = vld [vmem:[#allocation5 + $0x200] sm:$0xff]  ;;  %v1138_v4 = vcombine.low %v177_v1, %v181_v3 }
  0x3b   :  { %935 = vmatprep.subr.bf16.mxu0 %v1075_v6  ;;  %v180_v0 = vld [vmem:[#allocation5 + $0x220] sm:$0xff]  ;;  %v1139_v5 = vcombine.high %v177_v1, %v181_v3  ;;  %v127_v1 = vld [vmem:[#allocation5 + $0x78] sm:$0xff] }
  0x3c   :  { %v1137_v2 = vcombine.high %v176_v63, %v180_v0  ;;  %v1136_v6 = vcombine.low %v176_v63, %v180_v0  ;;  %v126_v63 = vld [vmem:[#allocation5 + $0x70] sm:$0xff]  ;;  %v123_v0 = vld [vmem:[#allocation5 + $0x58] sm:$0xff] }
  0x3d   :  { %895 = vmatpush1.bf16.msra.mxu1 %v1072_v7  ;;  %v170_v7 = vld [vmem:[#allocation5 + $0x1d0] sm:$0xff] }
  0x3e   :  { %896 = vmatprep.subr.bf16.mxu1 %v1193_v8  ;;  %936 = vmatpush1.bf16.msra.mxu0 %v1074_v13  ;;  %v174_v8 = vld [vmem:[#allocation5 + $0x1f0] sm:$0xff]  ;;  %v1134_v13 = vcombine.low %v171_v9, %v175_v11 }
  0x3f   :  { %937 = vmatprep.subr.bf16.mxu0 %v1195_v14  ;;  %v1133_v10 = vcombine.high %v170_v7, %v174_v8  ;;  %v1132_v12 = vcombine.low %v170_v7, %v174_v8  ;;  %v1135_v14 = vcombine.high %v171_v9, %v175_v11  ;;  %v118_v7 = vld [vmem:[#allocation5 + $0x30] sm:$0xff]  ;;  %v115_v8 = vld [vmem:[#allocation5 + $0x18] sm:$0xff]  ;;  %v1086_v11 = vcombine.low %v123_v0, %v127_v1 }
  0x40   :  { %v119_v9 = vld [vmem:[#allocation5 + $0x38] sm:$0xff] }
  0x41   :  { %897 = vmatpush2.bf16.msra.mxu1 %v1192_v15 }
  0x42   :  { %898 = vmatprep.subr.bf16.mxu1 %v1185_v16  ;;  %938 = vmatpush2.bf16.msra.mxu0 %v1194_v21 }
  0x43   :  { %939 = vmatprep.subr.bf16.mxu0 %v1187_v22  ;;  %v166_v22 = vld [vmem:[#allocation5 + $0x1b0] sm:$0xff] }
  0x44   :  { %v1124_v34 = vcombine.low %v162_v20, %v166_v22 }
  0x45   :  { %899 = vmatpush2.bf16.msra.mxu1 %v1184_v23  ;;  %v163_v23 = vld [vmem:[#allocation5 + $0x198] sm:$0xff] }
  0x46   :  { %900 = vmatprep.subr.bf16.mxu1 %v1177_v24  ;;  %940 = vmatpush2.bf16.msra.mxu0 %v1186_v29  ;;  %v167_v24 = vld [vmem:[#allocation5 + $0x1b8] sm:$0xff]  ;;  %v1125_v29 = vcombine.high %v162_v20, %v166_v22  ;;  %v226_v22 = vld [vmem:[#allocation5 + $0x390] sm:$0xff] }
  0x47   :  { %941 = vmatprep.subr.bf16.mxu0 %v1179_v30  ;;  %v1127_v30 = vcombine.high %v163_v23, %v167_v24  ;;  %v1126_v35 = vcombine.low %v163_v23, %v167_v24  ;;  %v230_v23 = vld [vmem:[#allocation5 + $0x3b0] sm:$0xff]  ;;  %v227_v24 = vld [vmem:[#allocation5 + $0x398] sm:$0xff] }
  0x49   :  { %901 = vmatpush2.bf16.msra.mxu1 %v1176_v31  ;;  %v158_v31 = vld [vmem:[#allocation5 + $0x170] sm:$0xff] }
  0x4a   :  { %902 = vmatprep.subr.bf16.mxu1 %v1169_v32  ;;  %942 = vmatpush2.bf16.msra.mxu0 %v1178_v37  ;;  %v155_v32 = vld [vmem:[#allocation5 + $0x158] sm:$0xff]  ;;  %v1117_v36 = vcombine.high %v154_v28, %v158_v31  ;;  %v1116_v42 = vcombine.low %v154_v28, %v158_v31  ;;  %v218_v31 = vld [vmem:[#allocation5 + $0x350] sm:$0xff] }
  0x4b   :  { %943 = vmatprep.subr.bf16.mxu0 %v1171_v38  ;;  %v1119_v37 = vcombine.high %v155_v32, %v159_v33  ;;  %v146_v38 = vld [vmem:[#allocation5 + $0x110] sm:$0xff]  ;;  %v1118_v43 = vcombine.low %v155_v32, %v159_v33  ;;  %v219_v33 = vld [vmem:[#allocation5 + $0x358] sm:$0xff] }
  0x4c   :  { %v222_v32 = vld [vmem:[#allocation5 + $0x370] sm:$0xff] }
  0x4d   :  { %903 = vmatpush2.bf16.msra.mxu1 %v1168_v39  ;;  %v150_v39 = vld [vmem:[#allocation5 + $0x130] sm:$0xff] }
  0x4e   :  { %904 = vmatprep.subr.bf16.mxu1 %v1161_v40  ;;  %944 = vmatpush2.bf16.msra.mxu0 %v1170_v45  ;;  %v147_v40 = vld [vmem:[#allocation5 + $0x118] sm:$0xff]  ;;  %v1109_v44 = vcombine.high %v146_v38, %v150_v39  ;;  %v1108_v50 = vcombine.low %v146_v38, %v150_v39  ;;  %v210_v39 = vld [vmem:[#allocation5 + $0x310] sm:$0xff] }
  0x4f   :  { %945 = vmatprep.subr.bf16.mxu0 %v1163_v46  ;;  %v1111_v45 = vcombine.high %v147_v40, %v151_v41  ;;  %v138_v46 = vld [vmem:[#allocation5 + $0xd0] sm:$0xff]  ;;  %v1110_v51 = vcombine.low %v147_v40, %v151_v41  ;;  %v211_v41 = vld [vmem:[#allocation5 + $0x318] sm:$0xff] }
  0x50   :  { %v214_v40 = vld [vmem:[#allocation5 + $0x330] sm:$0xff] }
  0x51   :  { %905 = vmatpush2.bf16.msra.mxu1 %v1160_v47  ;;  %v142_v47 = vld [vmem:[#allocation5 + $0xf0] sm:$0xff] }
  0x52   :  { %906 = vmatprep.subr.bf16.mxu1 %v1153_v48  ;;  %946 = vmatpush2.bf16.msra.mxu0 %v1162_v53  ;;  %v139_v48 = vld [vmem:[#allocation5 + $0xd8] sm:$0xff]  ;;  %v1101_v52 = vcombine.high %v138_v46, %v142_v47  ;;  %v1100_v58 = vcombine.low %v138_v46, %v142_v47  ;;  %v202_v47 = vld [vmem:[#allocation5 + $0x2d0] sm:$0xff] }
  0x53   :  { %947 = vmatprep.subr.bf16.mxu0 %v1155_v54  ;;  %v1103_v53 = vcombine.high %v139_v48, %v143_v49  ;;  %v130_v54 = vld [vmem:[#allocation5 + $0x90] sm:$0xff] }
  0x55   :  { %907 = vmatpush2.bf16.msra.mxu1 %v1152_v55  ;;  %v134_v55 = vld [vmem:[#allocation5 + $0xb0] sm:$0xff] }
  0x56   :  { %908 = vmatprep.subr.bf16.mxu1 %v1145_v56  ;;  %948 = vmatpush2.bf16.msra.mxu0 %v1154_v59  ;;  %v131_v56 = vld [vmem:[#allocation5 + $0x98] sm:$0xff]  ;;  %v1102_v59 = vcombine.low %v139_v48, %v143_v49  ;;  %v206_v48 = vld [vmem:[#allocation5 + $0x2f0] sm:$0xff] }
  0x57   :  { %949 = vmatprep.subr.bf16.mxu0 %v1147_v60  ;;  %v1093_v60 = vcombine.high %v130_v54, %v134_v55  ;;  %v1094_v3 = vcombine.low %v131_v56, %v135_v57  ;;  %v203_v49 = vld [vmem:[#allocation5 + $0x2d8] sm:$0xff] }
  0x59   :  { %909 = vmatpush2.bf16.msra.mxu1 %v1144_v61  ;;  %v1095_v61 = vcombine.high %v131_v56, %v135_v57  ;;  %v198_v56 = vld [vmem:[#allocation5 + $0x2b0] sm:$0xff]  ;;  %v195_v57 = vld [vmem:[#allocation5 + $0x298] sm:$0xff] }
  0x5a   :  { %950 = vmatpush2.bf16.msra.mxu0 %v1146_v62  ;;  %910 = vmatprep.subr.bf16.mxu1 %v1137_v2  ;;  %v122_v62 = vld [vmem:[#allocation5 + $0x50] sm:$0xff]  ;;  %v1092_v2 = vcombine.low %v130_v54, %v134_v55 }
  0x5b   :  { %951 = vmatprep.subr.bf16.mxu0 %v1139_v5  ;;  %v1087_v5 = vcombine.high %v123_v0, %v127_v1  ;;  %v194_v55 = vld [vmem:[#allocation5 + $0x290] sm:$0xff]  ;;  %v187_v1 = vld [vmem:[#allocation5 + $0x258] sm:$0xff] }
  0x5c   :  { %v190_v0 = vld [vmem:[#allocation5 + $0x270] sm:$0xff] }
  0x5d   :  { %911 = vmatpush2.bf16.msra.mxu1 %v1136_v6  ;;  %v114_v6 = vld [vmem:[#allocation5 + $0x10] sm:$0xff] }
  0x5e   :  { %952 = vmatpush2.bf16.msra.mxu0 %v1138_v4  ;;  %962 = vmatprep.subr.bf16.mxu1 %v1133_v10  ;;  %v1085_v4 = vcombine.high %v122_v62, %v126_v63  ;;  %v1084_v10 = vcombine.low %v122_v62, %v126_v63  ;;  %v186_v63 = vld [vmem:[#allocation5 + $0x250] sm:$0xff] }
  0x5f   :  { %1003 = vmatprep.subr.bf16.mxu0 %v1135_v14  ;;  %v234_v14 = vld [vmem:[#allocation5 + $0x3d0] sm:$0xff] }
  0x97   :  { %v51_v15 = vpop.permute.xlu0 %50 }
  0xe1   :  { %v103_v16 = vpop.f32.mrf.mxu0 }
  0xe2   :  { %v104_v17 = vadd.f32 %v103_v16, %v51_v15  ;;  %v235_v16 = vld [vmem:[#allocation5 + $0x3d8] sm:$0xff] }
  0xe3   :  { %v105_v18 = vpop.f32.mrf.mxu0 }
  0xe4   :  { %v106_v19 = vadd.f32 %v105_v18, %v51_v15  ;;  %v1318_v26 = vpack.c.bf16 %v104_v17, %v104_v17  ;;  %v238_v15 = vld [vmem:[#allocation5 + $0x3f0] sm:$0xff]  ;;  %v239_v17 = vld [vmem:[#allocation5 + $0x3f8] sm:$0xff]  ;;  %v1076_v18 = vcombine.low %v114_v6, %v118_v7 }
  0xe5   :  { %v107_v21 = vpop.f32.mrf.mxu0  ;;  %v1197_v20 = vcombine.high %v234_v14, %v238_v15  ;;  %v1198_v28 = vcombine.low %v235_v16, %v239_v17 }
  0xe6   :  { %v111_v25 = vpack.c.bf16 %v106_v19, %v106_v19  ;;  %v1078_v19 = vcombine.low %v115_v8, %v119_v9  ;;  %v1199_v21 = vcombine.high %v235_v16, %v239_v17 }
  0xe7   :  { %v108_v27 = vpop.f32.mrf.mxu0 }
  0xe8   :  { %912 = vmatprep.mubr.bf16.mxu1 %v111_v25  ;;  %953 = vmatprep.mubr.bf16.mxu0 %v111_v25  ;;  %v1196_v27 = vcombine.low %v234_v14, %v238_v15 }
  0xe9   :  { %913 = vmatmul.mubr.bf16.vlgmr.msra.gmra.mxu1 %v1318_v26  ;;  %954 = vmatmul.mubr.bf16.vlgmr.msra.gmra.mxu0 %v1318_v26 }
  0xea   :  { %963 = vmatpush1.bf16.msra.mxu1 %v1132_v12  ;;  %1004 = vmatpush1.bf16.msra.mxu0 %v1134_v13  ;;  %v1077_v12 = vcombine.high %v114_v6, %v118_v7  ;;  %v1079_v13 = vcombine.high %v115_v8, %v119_v9  ;;  %v178_v7 = vld [vmem:[#allocation5 + $0x210] sm:$0xff]  ;;  %v179_v9 = vld [vmem:[#allocation5 + $0x218] sm:$0xff] }
  0xeb   :  { %994 = vmatprep.mubr.bf16.mxu1 %v111_v25  ;;  %1035 = vmatprep.mubr.bf16.mxu0 %v111_v25  ;;  %v231_v25 = vld [vmem:[#allocation5 + $0x3b8] sm:$0xff]  ;;  %v182_v8 = vld [vmem:[#allocation5 + $0x230] sm:$0xff] }
  0xec   :  { %964 = vmatprep.subr.bf16.mxu1 %v1125_v29  ;;  %1005 = vmatprep.subr.bf16.mxu0 %v1127_v30  ;;  %v1189_v29 = vcombine.high %v226_v22, %v230_v23  ;;  %v1191_v30 = vcombine.high %v227_v24, %v231_v25  ;;  %v1140_v15 = vcombine.low %v178_v7, %v182_v8 }
  0xee   :  { %965 = vmatpush1.bf16.msra.mxu1 %v1124_v34  ;;  %1006 = vmatpush1.bf16.msra.mxu0 %v1126_v35  ;;  %v223_v34 = vld [vmem:[#allocation5 + $0x378] sm:$0xff]  ;;  %v1188_v35 = vcombine.low %v226_v22, %v230_v23 }
  0xef   :  { %966 = vmatprep.subr.bf16.mxu1 %v1117_v36  ;;  %1007 = vmatprep.subr.bf16.mxu0 %v1119_v37  ;;  %v1190_v36 = vcombine.low %v227_v24, %v231_v25  ;;  %v1181_v37 = vcombine.high %v218_v31, %v222_v32  ;;  %v1183_v38 = vcombine.high %v219_v33, %v223_v34 }
  0xf2   :  { %967 = vmatpush1.bf16.msra.mxu1 %v1116_v42  ;;  %1008 = vmatpush1.bf16.msra.mxu0 %v1118_v43  ;;  %v215_v42 = vld [vmem:[#allocation5 + $0x338] sm:$0xff]  ;;  %v1180_v43 = vcombine.low %v218_v31, %v222_v32 }
  0xf3   :  { %968 = vmatprep.subr.bf16.mxu1 %v1109_v44  ;;  %1009 = vmatprep.subr.bf16.mxu0 %v1111_v45  ;;  %v1182_v44 = vcombine.low %v219_v33, %v223_v34  ;;  %v1173_v45 = vcombine.high %v210_v39, %v214_v40  ;;  %v1175_v46 = vcombine.high %v211_v41, %v215_v42 }
  0xf6   :  { %969 = vmatpush1.bf16.msra.mxu1 %v1108_v50  ;;  %1010 = vmatpush1.bf16.msra.mxu0 %v1110_v51  ;;  %v207_v50 = vld [vmem:[#allocation5 + $0x2f8] sm:$0xff]  ;;  %v1172_v51 = vcombine.low %v210_v39, %v214_v40 }
  0xf7   :  { %970 = vmatprep.subr.bf16.mxu1 %v1101_v52  ;;  %1011 = vmatprep.subr.bf16.mxu0 %v1103_v53  ;;  %v1174_v52 = vcombine.low %v211_v41, %v215_v42  ;;  %v1165_v53 = vcombine.high %v202_v47, %v206_v48  ;;  %v1167_v54 = vcombine.high %v203_v49, %v207_v50 }
  0xfa   :  { %971 = vmatpush1.bf16.msra.mxu1 %v1100_v58  ;;  %1012 = vmatpush1.bf16.msra.mxu0 %v1102_v59  ;;  %v199_v58 = vld [vmem:[#allocation5 + $0x2b8] sm:$0xff]  ;;  %v1164_v59 = vcombine.low %v202_v47, %v206_v48 }
  0xfb   :  { %972 = vmatprep.subr.bf16.mxu1 %v1093_v60  ;;  %1013 = vmatprep.subr.bf16.mxu0 %v1095_v61  ;;  %v1166_v60 = vcombine.low %v203_v49, %v207_v50  ;;  %v1157_v61 = vcombine.high %v194_v55, %v198_v56  ;;  %v1159_v62 = vcombine.high %v195_v57, %v199_v58 }
  0xfe   :  { %973 = vmatpush1.bf16.msra.mxu1 %v1092_v2  ;;  %1014 = vmatpush1.bf16.msra.mxu0 %v1094_v3  ;;  %v191_v2 = vld [vmem:[#allocation5 + $0x278] sm:$0xff]  ;;  %v1156_v3 = vcombine.low %v194_v55, %v198_v56 }
  0xff   :  { %974 = vmatprep.subr.bf16.mxu1 %v1085_v4  ;;  %1015 = vmatprep.subr.bf16.mxu0 %v1087_v5  ;;  %v1158_v4 = vcombine.low %v195_v57, %v199_v58  ;;  %v1149_v5 = vcombine.high %v186_v63, %v190_v0  ;;  %v1151_v6 = vcombine.high %v187_v1, %v191_v2 }
 0x102   :  { %975 = vmatpush1.bf16.msra.mxu1 %v1084_v10  ;;  %1016 = vmatpush1.bf16.msra.mxu0 %v1086_v11  ;;  %v183_v10 = vld [vmem:[#allocation5 + $0x238] sm:$0xff]  ;;  %v1148_v11 = vcombine.low %v186_v63, %v190_v0 }
 0x103   :  { %976 = vmatprep.subr.bf16.mxu1 %v1077_v12  ;;  %1017 = vmatprep.subr.bf16.mxu0 %v1079_v13  ;;  %v1150_v12 = vcombine.low %v187_v1, %v191_v2  ;;  %v1141_v13 = vcombine.high %v178_v7, %v182_v8  ;;  %v1143_v14 = vcombine.high %v179_v9, %v183_v10 }
 0x104   :  { %v1142_v16 = vcombine.low %v179_v9, %v183_v10 }
 0x106   :  { %977 = vmatpush1.bf16.msra.mxu1 %v1076_v18  ;;  %1018 = vmatpush1.bf16.msra.mxu0 %v1078_v19 }
 0x107   :  { %978 = vmatprep.subr.bf16.mxu1 %v1197_v20  ;;  %1019 = vmatprep.subr.bf16.mxu0 %v1199_v21 }
 0x10a   :  { %979 = vmatpush2.bf16.msra.mxu1 %v1196_v27  ;;  %1020 = vmatpush2.bf16.msra.mxu0 %v1198_v28 }
 0x10b   :  { %980 = vmatprep.subr.bf16.mxu1 %v1189_v29  ;;  %1021 = vmatprep.subr.bf16.mxu0 %v1191_v30 }
 0x10e   :  { %981 = vmatpush2.bf16.msra.mxu1 %v1188_v35  ;;  %1022 = vmatpush2.bf16.msra.mxu0 %v1190_v36 }
 0x10f   :  { %982 = vmatprep.subr.bf16.mxu1 %v1181_v37  ;;  %1023 = vmatprep.subr.bf16.mxu0 %v1183_v38 }
 0x112   :  { %983 = vmatpush2.bf16.msra.mxu1 %v1180_v43  ;;  %1024 = vmatpush2.bf16.msra.mxu0 %v1182_v44 }
 0x113   :  { %984 = vmatprep.subr.bf16.mxu1 %v1173_v45  ;;  %1025 = vmatprep.subr.bf16.mxu0 %v1175_v46 }
 0x116   :  { %985 = vmatpush2.bf16.msra.mxu1 %v1172_v51  ;;  %1026 = vmatpush2.bf16.msra.mxu0 %v1174_v52 }
 0x117   :  { %986 = vmatprep.subr.bf16.mxu1 %v1165_v53  ;;  %1027 = vmatprep.subr.bf16.mxu0 %v1167_v54 }
 0x11a   :  { %987 = vmatpush2.bf16.msra.mxu1 %v1164_v59  ;;  %1028 = vmatpush2.bf16.msra.mxu0 %v1166_v60 }
 0x11b   :  { %988 = vmatprep.subr.bf16.mxu1 %v1157_v61  ;;  %1029 = vmatprep.subr.bf16.mxu0 %v1159_v62 }
 0x11e   :  { %989 = vmatpush2.bf16.msra.mxu1 %v1156_v3  ;;  %1030 = vmatpush2.bf16.msra.mxu0 %v1158_v4 }
 0x11f   :  { %990 = vmatprep.subr.bf16.mxu1 %v1149_v5  ;;  %1031 = vmatprep.subr.bf16.mxu0 %v1151_v6 }
 0x122   :  { %991 = vmatpush2.bf16.msra.mxu1 %v1148_v11  ;;  %1032 = vmatpush2.bf16.msra.mxu0 %v1150_v12 }
 0x123   :  { %992 = vmatprep.subr.bf16.mxu1 %v1141_v13  ;;  %1033 = vmatprep.subr.bf16.mxu0 %v1143_v14 }
 0x126   :  { %993 = vmatpush2.bf16.msra.mxu1 %v1140_v15  ;;  %1034 = vmatpush2.bf16.msra.mxu0 %v1142_v16 }
 0x129   :  { %995 = vmatmul.mubr.bf16.vlgmr.msra.gmra.mxu1 %v1318_v26  ;;  %1036 = vmatmul.mubr.bf16.vlgmr.msra.gmra.mxu0 %v1318_v26 }
 0x1a9   :  { %v914_v17 = vpop.f32.mrf.mxu1  ;;  %v955_v18 = vpop.f32.mrf.mxu0 }
 0x1aa   :  { %1044 = vst [vmem:[#allocation7] sm:$0xff] %v914_v17  ;;  %1046 = vst [vmem:[#allocation7 + $0x10] sm:$0xff] %v955_v18 }
 0x1ab   :  { %v916_v19 = vpop.f32.mrf.mxu1  ;;  %v957_v20 = vpop.f32.mrf.mxu0 }
 0x1ac   :  { %1045 = vst [vmem:[#allocation7 + $0x8] sm:$0xff] %v916_v19  ;;  %1047 = vst [vmem:[#allocation7 + $0x18] sm:$0xff] %v957_v20 }
 0x1ad   :  { %v918_v21 = vpop.f32.mrf.mxu1  ;;  %v959_v22 = vpop.f32.mrf.mxu0 }
 0x1af   :  { %v919_v23 = vpop.f32.mrf.mxu1  ;;  %v960_v24 = vpop.f32.mrf.mxu0 }
 0x1e9   :  { %v996_v25 = vpop.f32.mrf.mxu1  ;;  %v1037_v27 = vpop.f32.mrf.mxu0 }
 0x1ea   :  { %1048 = vst [vmem:[#allocation7 + $0x20] sm:$0xff] %v996_v25  ;;  %1050 = vst [vmem:[#allocation7 + $0x30] sm:$0xff] %v1037_v27 }
 0x1eb   :  { %v998_v26 = vpop.f32.mrf.mxu1  ;;  %v1039_v28 = vpop.f32.mrf.mxu0 }
 0x1ec   :  { %1049 = vst [vmem:[#allocation7 + $0x28] sm:$0xff] %v998_v26  ;;  %1051 = vst [vmem:[#allocation7 + $0x38] sm:$0xff] %v1039_v28 }
 0x1ed   :  { %v1000_v29 = vpop.f32.mrf.mxu1  ;;  %v1041_v30 = vpop.f32.mrf.mxu0 }
 0x1ee   :  { %1260 = shalt.err (!%p1257_p0)
}
 0x1ef   :  { %1061 = dma.vmem_to_hbm [thread:$0]  %s1059_s2, 1024, %s1331_s4, [#allocation4]   ;;  %v1001_v31 = vpop.f32.mrf.mxu1  ;;  %v1042_v32 = vpop.f32.mrf.mxu0 }
 0x1f0   :  { %1273 = dma.done.wait [#allocation4], 1024  }
 0x1f1   :  { %1274 = vsyncadd [#allocation4], 4294966272 }
 0x1f2   :  { %1065 = vsyncpa [#allocation3], 1 }
 0x1f3   :  { %1066 = vsyncpa [#allocation6], 1 }
 0x1f4   :  { %1067 = vsyncpa [#allocation4], 1 }

</bundles_post_ra>
